<compile_context>
chip_gen: v7x
topology: tpu7x:2x2x1
jax: 0.10.0
libtpu: 0.0.40
codegen_flags: <defaults>
</compile_context>

<pallas_src>
import functools

import jax
import jax.numpy as jnp
import numpy as np
from jax import lax
from jax.experimental import pallas as pl
from jax.experimental.pallas import tpu as pltpu

_LANES = 128
_SUBLANES = 8
_CHUNK_ROWS = 512                    # in-kernel compute sub-chunk (256 KiB f32)
_TILE_BYTES = 4 * 1024 * 1024        # HBM bytes per operand per grid tile
_FAST_PATH_MAX_ROWS = 2048           # <= 1 MiB/operand f32: single-block path


def _compute_dtype(dt_x, dt_t):
    # Keep bf16 math in bf16 (native VALU on v6e/v7x, auto-extended on v5e);
    # everything else is upcast to f32.
    if jnp.dtype(dt_x) == jnp.bfloat16 and jnp.dtype(dt_t) == jnp.bfloat16:
        return jnp.bfloat16
    return jnp.float32


def _diff(x, t, *, penalty):
    """GNINA affinity diff in the compute dtype of x/t.

    torch:  diff = where(t > 0, x - t, 0)
            diff = where((t < 0) & (t > -x), x + t + penalty, diff)
    The two conditions are disjoint, and (t > -x) == (x + t > 0), so this is a
    single nested select reusing s = x + t.
    """
    s = x + t
    pen = s if penalty == 0.0 else s + jnp.asarray(penalty, x.dtype)
    zero = jnp.zeros_like(x)
    bad = jnp.where(jnp.logical_and(t < 0, s > 0), pen, zero)
    return jnp.where(t > 0, x - t, bad)


def _loss_from_diff(diff32, *, inv_delta, delta2, pseudo_huber):
    """Per-element loss from the (already f32) diff."""
    if pseudo_huber:
        sd = diff32 * inv_delta                 # multiply by precomputed 1/delta
        y = 1.0 + sd * sd
        # sqrt(y) = y * rsqrt(y): the transcendental goes to the EUP slot.
        return delta2 * (y * lax.rsqrt(y) - 1.0)
    return diff32 * diff32


def _affinity_loss_single_kernel(x_ref, t_ref, out_ref, *, inv_delta, delta2,
                                 penalty, pseudo_huber, reduction, scale,
                                 n_elements, compute_dtype):
    """Fast path: whole problem in one VMEM block; grid-less call."""
    x = x_ref[...].astype(compute_dtype)
    t = t_ref[...].astype(compute_dtype)
    d = _diff(x, t, penalty=penalty).astype(jnp.float32)
    loss = _loss_from_diff(d, inv_delta=inv_delta, delta2=delta2,
                           pseudo_huber=pseudo_huber)
    total = jnp.sum(loss)                       # single reduce for the problem
    if reduction == "mean":
        total = total / jnp.float32(n_elements)
    out_ref[0] = jnp.float32(scale) * total


def _affinity_loss_tiled_kernel(x_ref, t_ref, psum_ref, *, inv_delta, delta2,
                                penalty, pseudo_huber, compute_dtype,
                                chunk_rows, n_chunks, total_rows, row_tile,
                                mask_tail):
    """Tiled path: loop over `chunk_rows`-row sub-slices of a multi-MiB block,
    accumulating a vreg-shaped (1, 8, 128) partial sum.  No cross-step state,
    so the grid axis is 'parallel' (megacore-friendly on v7x)."""
    if mask_tail:
        tile_row0 = pl.program_id(0) * row_tile
        # Loop-invariant local row index (hoisted out of the chunk loop).
        row_iota = lax.broadcasted_iota(jnp.int32, (chunk_rows, 1), 0)

    def body(c, acc):
        r0 = c * chunk_rows
        r0h = pl.multiple_of(r0, chunk_rows)
        x = x_ref[pl.ds(r0h, chunk_rows), :].astype(compute_dtype)
        t = t_ref[pl.ds(r0h, chunk_rows), :].astype(compute_dtype)
        d = _diff(x, t, penalty=penalty).astype(jnp.float32)
        loss = _loss_from_diff(d, inv_delta=inv_delta, delta2=delta2,
                               pseudo_huber=pseudo_huber)
        if mask_tail:
            # Zero out rows past the end of the (ragged) last tile; the edge
            # block's out-of-bounds rows contain unspecified data.
            bound = total_rows - tile_row0 - r0
            loss = jnp.where(row_iota < bound, loss, 0.0)
        # (chunk_rows, 128) -> (1, chunk_rows//8, 8, 128) -> sum over the
        # tile-of-vregs axis: pure VPU adds, no per-chunk cross-lane reduce.
        return acc + loss.reshape(1, -1, _SUBLANES, _LANES).sum(axis=1)

    acc = lax.fori_loop(0, n_chunks, body,
                        jnp.zeros((1, _SUBLANES, _LANES), jnp.float32))
    psum_ref[...] = acc


def affinity_loss(inp, tgt, *, reduction="mean", delta=1.0, penalty=0.0,
                  pseudo_huber=False, scale=1.0):
    """Pallas implementation of AffinityLoss.forward. Returns a scalar f32."""
    assert inp.shape == tgt.shape
    assert reduction in ("mean", "sum")
    n = int(np.prod(inp.shape))

    inv_delta = 1.0 / float(delta)
    delta2 = float(delta) * float(delta)
    penalty = float(penalty)
    scale = float(scale)
    pseudo_huber = bool(pseudo_huber)

    if n == 0:
        # Match torch: mean of empty -> nan, sum of empty -> 0.
        base = jnp.float32(jnp.nan) if reduction == "mean" else jnp.float32(0.0)
        return jnp.float32(scale) * base

    compute_dtype = _compute_dtype(inp.dtype, tgt.dtype)
    rows = -(-n // _LANES)                       # ceil(n / 128)
    aligned = (n % _LANES == 0)

    def as_rows(a):
        if aligned:
            return a.reshape(rows, _LANES)       # no padding copy
        # TODO(synk): non-128-multiple sizes still pay one padded copy; a fully
        # copy-free ragged tail would need a manual-DMA (pl.ANY) kernel.
        flat = a.reshape(-1)
        flat = jnp.pad(flat, (0, rows * _LANES - n))   # zero pad is loss-neutral
        return flat.reshape(rows, _LANES)

    common = dict(inv_delta=inv_delta, delta2=delta2, penalty=penalty,
                  pseudo_huber=pseudo_huber, compute_dtype=compute_dtype)

    if rows <= _FAST_PATH_MAX_ROWS:
        # ---- Fast path: single block, grid-less call, scalar SMEM output ----
        x2, t2 = as_rows(inp), as_rows(tgt)
        kernel = functools.partial(_affinity_loss_single_kernel,
                                   reduction=reduction, scale=scale,
                                   n_elements=n, **common)
        out = pl.pallas_call(
            kernel,
            out_shape=jax.ShapeDtypeStruct((1,), jnp.float32),
            in_specs=[pl.BlockSpec(memory_space=pltpu.MemorySpace.VMEM),
                      pl.BlockSpec(memory_space=pltpu.MemorySpace.VMEM)],
            out_specs=pl.BlockSpec(memory_space=pltpu.MemorySpace.SMEM),
        )(x2, t2)
        return out[0]

    # ---- Tiled path: multi-MiB DMA tiles, 512-row compute chunks ----------
    itemsize = max(jnp.dtype(inp.dtype).itemsize, jnp.dtype(tgt.dtype).itemsize)
    row_tile = _TILE_BYTES // (_LANES * itemsize)        # 8192 f32 / 16384 bf16
    row_tile = max(_CHUNK_ROWS, (row_tile // _CHUNK_ROWS) * _CHUNK_ROWS)
    # Don't grossly over-size the tile for mid-size inputs.
    row_tile = min(row_tile, -(-rows // _CHUNK_ROWS) * _CHUNK_ROWS)

    num_tiles = -(-rows // row_tile)
    mask_tail = (rows % row_tile) != 0           # ragged last tile needs a mask

    x2, t2 = as_rows(inp), as_rows(tgt)

    kernel = functools.partial(
        _affinity_loss_tiled_kernel,
        chunk_rows=_CHUNK_ROWS, n_chunks=row_tile // _CHUNK_ROWS,
        total_rows=rows, row_tile=row_tile, mask_tail=mask_tail, **common)

    partials = pl.pallas_call(
        kernel,
        out_shape=jax.ShapeDtypeStruct((num_tiles, _SUBLANES, _LANES),
                                       jnp.float32),
        grid_spec=pltpu.PrefetchScalarGridSpec(
            num_scalar_prefetch=0,
            grid=(num_tiles,),
            in_specs=[
                pl.BlockSpec((row_tile, _LANES), lambda i: (i, 0)),
                pl.BlockSpec((row_tile, _LANES), lambda i: (i, 0)),
            ],
            out_specs=pl.BlockSpec((1, _SUBLANES, _LANES),
                                   lambda i: (i, 0, 0)),
        ),
        compiler_params=pltpu.CompilerParams(
            # Independent tiles: lets v7x shard the grid across both TCs.
            dimension_semantics=("parallel",),
            # 2 operands x 2 buffers x 4 MiB = 16 MiB + small temporaries;
            # 48 MiB leaves headroom and stays under v7x's 64 MiB physical.
            vmem_limit_bytes=48 * 1024 * 1024),
    )(x2, t2)

    # Tiny final reduce + mean/scale in the wrapper (negligible vs HBM stream).
    total = jnp.sum(partials)
    if reduction == "mean":
        total = total / jnp.float32(n)
    return jnp.float32(scale) * total


def _reference(inp, tgt, *, reduction, delta, penalty, pseudo_huber, scale):
    inp = inp.astype(jnp.float32)
    tgt = tgt.astype(jnp.float32)
    diff = jnp.where(tgt > 0, inp - tgt, jnp.zeros_like(inp))
    diff = jnp.where(jnp.logical_and(tgt < 0, tgt > -inp),
                     inp + tgt + penalty, diff)
    if pseudo_huber:
        sd = diff / delta
        loss = (delta * delta) * (jnp.sqrt(1.0 + sd * sd) - 1.0)
    else:
        loss = diff * diff
    red = jnp.mean(loss) if reduction == "mean" else jnp.sum(loss)
    return scale * red


def _make_data(key, n, dtype=jnp.float32):
    k1, k2, k3 = jax.random.split(key, 3)
    pred = jax.random.uniform(k1, (n,), jnp.float32, minval=0.0, maxval=10.0)
    targ = jax.random.uniform(k2, (n,), jnp.float32, minval=-10.0, maxval=10.0)
    mask = jax.random.bernoulli(k3, 0.2, (n,))
    targ = jnp.where(mask, 0.0, targ)
    return pred.astype(dtype), targ.astype(dtype)


if __name__ == "__main__":
    configs = [
        dict(reduction="mean", delta=1.0, penalty=0.0, pseudo_huber=False, scale=1.0),
        dict(reduction="sum", delta=2.0, penalty=1.0, pseudo_huber=True, scale=0.5),
    ]

    ok = True

    def check(name, pred, targ, cfg, rtol, atol):
        global ok
        got = jax.block_until_ready(affinity_loss(pred, targ, **cfg))
        want = jax.block_until_ready(_reference(pred, targ, **cfg))
        if not np.allclose(np.asarray(got), np.asarray(want), rtol=rtol, atol=atol):
            ok = False
            print("MISMATCH", name, cfg, float(got), float(want))

    # --- Small problem (fast path, zero-copy): batch of 256 pK values -------
    pred_s, targ_s = _make_data(jax.random.PRNGKey(0), 256)
    for cfg in configs:
        check("small", pred_s, targ_s, cfg, 1e-5, 1e-5)

    # --- Large, 128-aligned f32 (tiled path, ragged last tile, no pad) ------
    n_big = (2 * 8192 + 2048) * 128          # 2,359,296 elements
    pred_b, targ_b = _make_data(jax.random.PRNGKey(1), n_big)
    for cfg in configs:
        check("big f32", pred_b, targ_b, cfg, 1e-4, 1e-4)

    # --- Native bf16 inputs: bf16 stays in HBM and in the select math -------
    pred_h = pred_b.astype(jnp.bfloat16)
    targ_h = targ_b.astype(jnp.bfloat16)
    check("big bf16", pred_h, targ_h, configs[0], 1e-3, 1e-3)

    # --- Non-128-multiple size (padded fallback path) ------------------------
    pred_u, targ_u = _make_data(jax.random.PRNGKey(2), 600_000)
    check("big unaligned f32", pred_u, targ_u, configs[0], 1e-4, 1e-4)

    if ok:
        print("KERNEL_OK")
</pallas_src>

<mosaic_0001>
module attributes {stable_mosaic.version = 11 : i64} {
  func.func @_affinity_loss_single_kernel(%arg0: memref<2x128xf32, #tpu.memory_space<vmem>>, %arg1: memref<2x128xf32, #tpu.memory_space<vmem>>, %arg2: memref<1xf32, #tpu.memory_space<smem>>) attributes {dimension_semantics = [], scalar_prefetch = 0 : i64, scratch_operands = 0 : i64, tpu.core_type = #tpu.core_type<tc>} {
    %c0 = arith.constant 0 : index
    %c0_0 = arith.constant 0 : index
    %0 = vector.load %arg0[%c0, %c0_0] : memref<2x128xf32, #tpu.memory_space<vmem>>, vector<2x128xf32>
    %c0_1 = arith.constant 0 : index
    %c0_2 = arith.constant 0 : index
    %1 = vector.load %arg1[%c0_1, %c0_2] : memref<2x128xf32, #tpu.memory_space<vmem>>, vector<2x128xf32>
    %2 = arith.addf %0, %1 : vector<2x128xf32>
    %cst = arith.constant 0.000000e+00 : f32
    %3 = vector.broadcast %cst : f32 to vector<2x128xf32>
    %cst_3 = arith.constant 0.000000e+00 : f32
    %4 = vector.broadcast %cst_3 : f32 to vector<2x128xf32>
    %5 = arith.cmpf olt, %1, %4 : vector<2x128xf32>
    %cst_4 = arith.constant 0.000000e+00 : f32
    %6 = vector.broadcast %cst_4 : f32 to vector<2x128xf32>
    %7 = arith.cmpf ogt, %2, %6 : vector<2x128xf32>
    %8 = arith.andi %5, %7 : vector<2x128xi1>
    %9 = arith.select %8, %2, %3 : vector<2x128xi1>, vector<2x128xf32>
    %cst_5 = arith.constant 0.000000e+00 : f32
    %10 = vector.broadcast %cst_5 : f32 to vector<2x128xf32>
    %11 = arith.cmpf ogt, %1, %10 : vector<2x128xf32>
    %12 = arith.subf %0, %1 : vector<2x128xf32>
    %13 = arith.select %11, %12, %9 : vector<2x128xi1>, vector<2x128xf32>
    %14 = arith.mulf %13, %13 : vector<2x128xf32>
    %15 = vector.shape_cast %14 : vector<2x128xf32> to vector<1x2x128xf32>
    %cst_6 = arith.constant dense<0.000000e+00> : vector<1xf32>
    %16 = vector.multi_reduction <add>, %15, %cst_6 [1, 2] : vector<1x2x128xf32> to vector<1xf32>
    %17 = vector.shape_cast %16 : vector<1xf32> to vector<1x1x1xf32>
    %18 = vector.extract %17[0, 0, 0] : f32 from vector<1x1x1xf32>
    %cst_7 = arith.constant 2.560000e+02 : f32
    %19 = arith.divf %18, %cst_7 : f32
    %cst_8 = arith.constant 1.000000e+00 : f32
    %20 = arith.mulf %cst_8, %19 : f32
    %c0_9 = arith.constant 0 : index
    %21 = memref.load %arg2[%c0_9] : memref<1xf32, #tpu.memory_space<smem>>
    memref.store %20, %arg2[%c0_9] : memref<1xf32, #tpu.memory_space<smem>>
    return
  }
}

</mosaic_0001>

<bundles_post_ra>
// kernel: tpu_custom_call.1
= control target key start
LH: loop header
LB: loop body
LE: loop exit
PB: predicated region body
PF: predicated region fallthrough
CT: control target
= control target key end

     0   :  { %7 = vsyncpa [#allocation3], 0  ;;  %s149_s0 = inlined_call_operand.hbm [shape: f32[2,128], index: 0, kind: input, shape index: {}]   ;;  %s150_s1 = inlined_call_operand.vmem [shape: f32[2,128], index: 1, kind: input, shape index: {}]   ;;  %s151_s2 = inlined_call_operand.hbm [shape: f32[1], index: 2, kind: output, shape index: {}]  }
   0x1   :  { %8 = vsyncpa [#allocation4], 0  ;;  %s105_s9 = smov [#allocation2]   ;;  %s69_s13 = scalar_lea.hbm %s149_s0, 32 }
   0x2   :  { %s15_s10 = sshll.u32 %s105_s9, 4  ;;  %p70_p0 = scmp.ne.s32.totalorder %s149_s0, %s69_s13  ;;  %s16_s10 = int_to_ptr.vmem [resolvable:$true] %s15_s10 }
   0x3   :  { %p73_p1 = scmp.lt.u32.totalorder %s69_s13, %s149_s0 }
   0x5   :  { %p75_p2 = pnand %p73_p1, %p70_p0 }
   0x7   :  { %78 = shalt.err (!%p75_p2)
}
   0x8   :  { %s79_s18 = scalar_lea.vmem %s16_s10, 32  ;;  %p84_p4 = scmp.lt.s32.totalorder %s16_s10, %s16_s10 }
   0x9   :  { %p80_p3 = scmp.ne.s32.totalorder %s16_s10, %s79_s18  ;;  %p85_p5 = scmp.lt.s32.totalorder %s79_s18, %s79_s18 }
   0xb   :  { %p86_p6 = por %p85_p5, %p84_p4 }
   0xd   :  { %p87_p7 = pnand %p86_p6, %p80_p3 }
   0xf   :  { %90 = shalt.err (!%p87_p7)
}
  0x10   :  { %18 = dma.hbm_to_vmem [thread:$0]  %s149_s0, 32, %s16_s10, [#allocation3]  }
  0x11   :  { %101 = dma.done.wait [#allocation3], 32  }
  0x12   :  { %102 = vsyncadd [#allocation3], 4294967264  ;;  %v24_v0 = vld [vmem:[#allocation2] sm:$0x3]  ;;  %vm35_vm4 = vcmask 1041408   ;;  %s91_s25 = scalar_lea.hbm %s151_s2, 16 }
  0x13   :  { %v25_v1 = vld [vmem:[%s150_s1] sm:$0x3]  ;;  %p92_p8 = scmp.ne.s32.totalorder %s151_s2, %s91_s25  ;;  %p95_p9 = scmp.lt.u32.totalorder %s91_s25, %s151_s2 }
  0x14   :  { %v26_v2 = vadd.f32 %v25_v1, %v24_v0  ;;  %vm27_vm0 = vcmp.lt.f32.partialorder %v25_v1, 0.0  ;;  %v32_v3 = vsub.f32 %v24_v0, %v25_v1  ;;  %vm31_vm2 = vcmp.gt.f32.partialorder %v25_v1, 0.0 }
  0x15   :  { %p97_p10 = pnand %p95_p9, %p92_p8 }
  0x16   :  { %vm28_vm1 = vcmp.gt.f32.partialorder %v26_v2, 0.0 }
  0x17   :  { %vm29_vm3 = vmand %vm27_vm0, %vm28_vm1 }
  0x18   :  { %v30_v4 = vsel %vm29_vm3, %v26_v2, 0.0 }
  0x19   :  { %v33_v5 = vsel %vm31_vm2, %v32_v3, %v30_v4 }
  0x1a   :  { %v34_v6 = vmul.f32 %v33_v5, %v33_v5 }
  0x1c   :  { %v36_v7 = vsel %vm35_vm4, %v34_v6, 0.0 }
  0x1d   :  { %37 = vadd.xlane.f32.xlu0 %v36_v7 }
  0xaa   :  { %v38_v8 = vpop.xlane.xlu0 %37 }
  0xab   :  { %v39_v9 = vrot.slane %v38_v8, 4 }
  0xad   :  { %v40_v10 = vadd.f32 %v39_v9, %v38_v8 }
  0xaf   :  { %v41_v11 = vrot.slane %v40_v10, 2 }
  0xb1   :  { %v42_v12 = vadd.f32 %v41_v11, %v40_v10 }
  0xb3   :  { %v43_v13 = vrot.slane %v42_v12, 1 }
  0xb5   :  { %v44_v14 = vadd.f32 %v43_v13, %v42_v12 }
  0xb7   :  { %65 = vpush %v44_v14 }
  0xe8   :  { %s66_s0 = spop %65 }
  0xe9   :  { %s48_s1 = smul.f32 0.00390625, %s66_s0 }
  0xeb   :  { %50 = sst [smem:[#allocation5]] %s48_s1 }
  0xec   :  { %100 = shalt.err (!%p97_p10)
}
  0xed   :  { %s106_s30 = smov [#allocation5]  }
  0xee   :  { %58 = dma.smem_to_hbm %s106_s30, 16, %s151_s2, [#allocation4]  }
  0xef   :  { %103 = dma.done.wait [#allocation4], 16  }
  0xf0   :  { %104 = vsyncadd [#allocation4], 4294967280 }
  0xf1   :  { %62 = sfence }
  0xf2   :  { %63 = vsyncpa [#allocation3], 1 }
  0xf3   :  { %64 = vsyncpa [#allocation4], 1 }

</bundles_post_ra>
